<compile_context>
chip_gen: v6e
topology: v6e:2x2x1
jax: 0.10.0
libtpu: 0.0.40
codegen_flags: <defaults>
</compile_context>

<pallas_src>
import jax
import jax.numpy as jnp
import numpy as np
from jax.experimental import pallas as pl
from jax.experimental.pallas import tpu as pltpu


# ----------------------------------------------------------------------------
# Pallas kernel: fused conv1 + relu + conv2 + relu + fc1 + relu + (fc2∘fc3)
# Feature-major: activations are (features, TILE_B), batch on the lane axis.
# ----------------------------------------------------------------------------
def _conv_model_kernel(x_ref, w1_ref, b1_ref, w2_ref, b2_ref,
                       w3_ref, b3_ref, w45_ref, b45_ref, out_ref):
    # x_ref  : (25, TILE_B) bf16  -- flattened 5x5 input, batch on lanes
    # w1_ref : (54, 25)     bf16  -- conv1 expanded over its 3x3 output positions
    # w2_ref : (16, 54)     bf16  -- conv2 folded over (position, cin) -> cout
    # w3_ref : (64, 16)     bf16  -- fcl_1
    # w45_ref: (64, 1)      f32   -- fc_2 scaled by fc_3 weight (VPU path)
    # b*_ref : (out, 1) f32 column biases in VMEM; b45_ref is (1, 1) f32 in SMEM.
    h1 = jnp.dot(w1_ref[...], x_ref[...], preferred_element_type=jnp.float32)
    h1 = jnp.maximum(h1 + b1_ref[...], 0.0)                       # relu(conv1), (54, B)

    h2 = jnp.dot(w2_ref[...], h1.astype(jnp.bfloat16),
                 preferred_element_type=jnp.float32)
    h2 = jnp.maximum(h2 + b2_ref[...], 0.0)                       # relu(conv2), (16, B)

    h3 = jnp.dot(w3_ref[...], h2.astype(jnp.bfloat16),
                 preferred_element_type=jnp.float32)
    h3 = jnp.maximum(h3 + b3_ref[...], 0.0)                       # relu(fcl_1), (64, B)

    # fc_2 ∘ fc_3 on VPU/XLU: scale by the fused (64,1) column, sublane-reduce.
    h4 = jnp.sum(h3 * w45_ref[...], axis=0, keepdims=True)        # (1, B)
    out_ref[...] = h4 + b45_ref[0, 0]                             # fused fc_2/fc_3 bias


# ----------------------------------------------------------------------------
# Wrapper: weight folding, batch (lane) tiling, pallas_call
# ----------------------------------------------------------------------------
def _expand_conv1_weight(W1):
    """Fold im2col into conv1: (6,1,3,3) -> (25, 54) mapping x_flat -> h1_flat.

    h1_flat index = p*6 + c, where p = i*3 + j is the conv1 output position and
    c is the output channel.  Zeros where the 3x3 window doesn't touch a pixel.
    """
    basis = np.zeros((25, 9, 9), np.float32)          # (pixel q, position p, tap k)
    for p in range(9):
        i, j = divmod(p, 3)
        for kh in range(3):
            for kw in range(3):
                q = (i + kh) * 5 + (j + kw)
                basis[q, p, kh * 3 + kw] = 1.0
    return jnp.einsum('qpk,ck->qpc', jnp.asarray(basis),
                      W1.reshape(6, 9)).reshape(25, 54)


def _round_up(a, b):
    return ((a + b - 1) // b) * b


def conv_model_forward(x, params, tile_b=4096):
    """x: (B, 1, 5, 5) float32.  params: PyTorch-shaped weights/biases."""
    W1, b1, W2, b2, W3, b3, W4, b4, W5, b5 = params
    B = x.shape[0]
    bf16 = jnp.bfloat16
    f32 = jnp.float32

    # ---- trace-time weight folding (tiny, done once) ----
    w1 = _expand_conv1_weight(W1).T.astype(bf16)                   # (54, 25)
    b1c = jnp.tile(b1, 9).reshape(54, 1).astype(f32)               # bias per (p, c)
    w2 = jnp.transpose(W2, (2, 3, 1, 0)).reshape(54, 16).T.astype(bf16)  # (16, 54)
    b2c = b2.reshape(16, 1).astype(f32)
    w3 = W3.astype(bf16)                                           # (64, 16)
    b3c = b3.reshape(64, 1).astype(f32)
    w45 = (W4 * W5[0, 0]).T.astype(f32)                            # (64, 1) fc2*fc3 (VPU)
    b45 = (b4 * W5[0, 0] + b5).reshape(1, 1).astype(f32)

    # ---- activation prep: flatten, transpose to feature-major, pad lanes ----
    x_fm = x.reshape(B, 25).T.astype(bf16)                         # (25, B), batch on lanes

    tile_b = max(128, (min(int(tile_b), 8192) // 128) * 128)       # multiple of 128 lanes
    bp = _round_up(B, 128)
    if bp <= tile_b:
        if bp >= 256:
            # v7x megacore: split into 2 grid steps so both TensorCores get work.
            tile_b = _round_up(bp // 2, 128)
        else:
            tile_b = bp
    bp = _round_up(bp, tile_b)
    if bp != B:
        x_fm = jnp.pad(x_fm, ((0, 0), (0, bp - B)))
    grid = (bp // tile_b,)

    resident = lambda shape: pl.BlockSpec(shape, lambda i: (0, 0))  # weights stay in VMEM

    out = pl.pallas_call(
        _conv_model_kernel,
        out_shape=jax.ShapeDtypeStruct((1, bp), jnp.float32),
        grid=grid,
        in_specs=[
            pl.BlockSpec((25, tile_b), lambda i: (0, i)),          # x, tiled over batch lanes
            resident((54, 25)), resident((54, 1)),
            resident((16, 54)), resident((16, 1)),
            resident((64, 16)), resident((64, 1)),
            resident((64, 1)),
            pl.BlockSpec(memory_space=pltpu.MemorySpace.SMEM),     # fused fc bias scalar
        ],
        out_specs=pl.BlockSpec((1, tile_b), lambda i: (0, i)),     # lane-dense store
        compiler_params=pltpu.CompilerParams(
            dimension_semantics=("parallel",)),
    )(x_fm, w1, b1c, w2, b2c, w3, b3c, w45, b45)
    return out[:, :B].T                                            # back to (B, 1)


# ----------------------------------------------------------------------------
# Pure-JAX reference (mirrors the PyTorch forward) for a sanity check
# ----------------------------------------------------------------------------
def _reference_forward(x, params):
    W1, b1, W2, b2, W3, b3, W4, b4, W5, b5 = params
    dn = ("NCHW", "OIHW", "NCHW")
    y = jax.lax.conv_general_dilated(x, W1, (1, 1), "VALID", dimension_numbers=dn)
    y = jax.nn.relu(y + b1[None, :, None, None])        # pool_1(1,1) = identity
    y = jax.lax.conv_general_dilated(y, W2, (1, 1), "VALID", dimension_numbers=dn)
    y = jax.nn.relu(y + b2[None, :, None, None])        # pool_2(1,1) = identity
    y = y.reshape(-1, 16)
    y = jax.nn.relu(y @ W3.T + b3)
    y = y @ W4.T + b4
    y = y @ W5.T + b5
    return y


def _init_params(key):
    ks = jax.random.split(key, 10)
    s = 0.1
    W1 = jax.random.normal(ks[0], (6, 1, 3, 3), jnp.float32) * s
    b1 = jax.random.normal(ks[1], (6,), jnp.float32) * s
    W2 = jax.random.normal(ks[2], (16, 6, 3, 3), jnp.float32) * s
    b2 = jax.random.normal(ks[3], (16,), jnp.float32) * s
    W3 = jax.random.normal(ks[4], (64, 16), jnp.float32) * s
    b3 = jax.random.normal(ks[5], (64,), jnp.float32) * s
    W4 = jax.random.normal(ks[6], (1, 64), jnp.float32) * s
    b4 = jax.random.normal(ks[7], (1,), jnp.float32) * s
    W5 = jax.random.normal(ks[8], (1, 1), jnp.float32) * s
    b5 = jax.random.normal(ks[9], (1,), jnp.float32) * s
    return (W1, b1, W2, b2, W3, b3, W4, b4, W5, b5)


if __name__ == "__main__":
    key = jax.random.PRNGKey(0)
    kx, kp = jax.random.split(key)
    x = jax.random.normal(kx, (2, 1, 5, 5), jnp.float32)   # NCHW, 5x5 spatial
    params = _init_params(kp)

    out = jax.block_until_ready(conv_model_forward(x, params))
    ref = jax.block_until_ready(_reference_forward(x, params))

    assert out.shape == (2, 1), out.shape
    # bf16 matmul inputs with f32 accumulation -> relaxed tolerance vs f32 ref
    assert jnp.allclose(out, ref, atol=5e-3, rtol=5e-2), (out, ref)

    print("KERNEL_OK")
</pallas_src>

<mosaic_0001>
module attributes {stable_mosaic.version = 11 : i64} {
  func.func @_conv_model_kernel(%arg0: i32, %arg1: memref<25x128xbf16, #tpu.memory_space<vmem>>, %arg2: memref<54x25xbf16, #tpu.memory_space<vmem>>, %arg3: memref<54x1xf32, #tpu.memory_space<vmem>>, %arg4: memref<16x54xbf16, #tpu.memory_space<vmem>>, %arg5: memref<16x1xf32, #tpu.memory_space<vmem>>, %arg6: memref<64x16xbf16, #tpu.memory_space<vmem>>, %arg7: memref<64x1xf32, #tpu.memory_space<vmem>>, %arg8: memref<64x1xf32, #tpu.memory_space<vmem>>, %arg9: memref<1x1xf32, #tpu.memory_space<smem>>, %arg10: memref<1x128xf32, #tpu.memory_space<vmem>>) attributes {dimension_semantics = [#tpu.dimension_semantics<parallel>], iteration_bounds = array<i64: 1>, scalar_prefetch = 0 : i64, scratch_operands = 0 : i64, tpu.core_type = #tpu.core_type<tc>, window_params = [{transform_indices = @transform_0, window_bounds = array<i64: 25, 128>}, {pipeline_mode = #tpu.pipeline_mode<synchronous>, transform_indices = @transform_1, window_bounds = array<i64: 54, 25>}, {pipeline_mode = #tpu.pipeline_mode<synchronous>, transform_indices = @transform_2, window_bounds = array<i64: 54, 1>}, {pipeline_mode = #tpu.pipeline_mode<synchronous>, transform_indices = @transform_3, window_bounds = array<i64: 16, 54>}, {pipeline_mode = #tpu.pipeline_mode<synchronous>, transform_indices = @transform_4, window_bounds = array<i64: 16, 1>}, {pipeline_mode = #tpu.pipeline_mode<synchronous>, transform_indices = @transform_5, window_bounds = array<i64: 64, 16>}, {pipeline_mode = #tpu.pipeline_mode<synchronous>, transform_indices = @transform_6, window_bounds = array<i64: 64, 1>}, {pipeline_mode = #tpu.pipeline_mode<synchronous>, transform_indices = @transform_7, window_bounds = array<i64: 64, 1>}, {transform_indices = @transform_8, window_bounds = array<i64: 1, 1>}, {transform_indices = @transform_9, window_bounds = array<i64: 1, 128>}]} {
    %c0 = arith.constant 0 : index
    %c0_0 = arith.constant 0 : index
    %0 = vector.load %arg2[%c0, %c0_0] : memref<54x25xbf16, #tpu.memory_space<vmem>>, vector<54x25xbf16>
    %c0_1 = arith.constant 0 : index
    %c0_2 = arith.constant 0 : index
    %1 = vector.load %arg1[%c0_1, %c0_2] : memref<25x128xbf16, #tpu.memory_space<vmem>>, vector<25x128xbf16>
    %cst = arith.constant dense<0.000000e+00> : vector<54x128xf32>
    %2 = tpu.matmul %0, %1, %cst {dimension_numbers = #tpu.dot_dimension_numbers<[1], [0], [0], [1], [0, 0, 1, 1], [], []>} : vector<54x25xbf16>, vector<25x128xbf16>, vector<54x128xf32> -> vector<54x128xf32>
    %c0_3 = arith.constant 0 : index
    %c0_4 = arith.constant 0 : index
    %3 = vector.load %arg3[%c0_3, %c0_4] : memref<54x1xf32, #tpu.memory_space<vmem>>, vector<54x1xf32>
    %4 = vector.broadcast %3 : vector<54x1xf32> to vector<54x128xf32>
    %5 = arith.addf %2, %4 : vector<54x128xf32>
    %cst_5 = arith.constant 0.000000e+00 : f32
    %6 = vector.broadcast %cst_5 : f32 to vector<54x128xf32>
    %7 = arith.maximumf %5, %6 : vector<54x128xf32>
    %c0_6 = arith.constant 0 : index
    %c0_7 = arith.constant 0 : index
    %8 = vector.load %arg4[%c0_6, %c0_7] : memref<16x54xbf16, #tpu.memory_space<vmem>>, vector<16x54xbf16>
    %9 = arith.truncf %7 : vector<54x128xf32> to vector<54x128xbf16>
    %cst_8 = arith.constant dense<0.000000e+00> : vector<16x128xf32>
    %10 = tpu.matmul %8, %9, %cst_8 {dimension_numbers = #tpu.dot_dimension_numbers<[1], [0], [0], [1], [0, 0, 1, 1], [], []>} : vector<16x54xbf16>, vector<54x128xbf16>, vector<16x128xf32> -> vector<16x128xf32>
    %c0_9 = arith.constant 0 : index
    %c0_10 = arith.constant 0 : index
    %11 = vector.load %arg5[%c0_9, %c0_10] : memref<16x1xf32, #tpu.memory_space<vmem>>, vector<16x1xf32>
    %12 = vector.broadcast %11 : vector<16x1xf32> to vector<16x128xf32>
    %13 = arith.addf %10, %12 : vector<16x128xf32>
    %cst_11 = arith.constant 0.000000e+00 : f32
    %14 = vector.broadcast %cst_11 : f32 to vector<16x128xf32>
    %15 = arith.maximumf %13, %14 : vector<16x128xf32>
    %c0_12 = arith.constant 0 : index
    %c0_13 = arith.constant 0 : index
    %16 = vector.load %arg6[%c0_12, %c0_13] : memref<64x16xbf16, #tpu.memory_space<vmem>>, vector<64x16xbf16>
    %17 = arith.truncf %15 : vector<16x128xf32> to vector<16x128xbf16>
    %cst_14 = arith.constant dense<0.000000e+00> : vector<64x128xf32>
    %18 = tpu.matmul %16, %17, %cst_14 {dimension_numbers = #tpu.dot_dimension_numbers<[1], [0], [0], [1], [0, 0, 1, 1], [], []>} : vector<64x16xbf16>, vector<16x128xbf16>, vector<64x128xf32> -> vector<64x128xf32>
    %c0_15 = arith.constant 0 : index
    %c0_16 = arith.constant 0 : index
    %19 = vector.load %arg7[%c0_15, %c0_16] : memref<64x1xf32, #tpu.memory_space<vmem>>, vector<64x1xf32>
    %20 = vector.broadcast %19 : vector<64x1xf32> to vector<64x128xf32>
    %21 = arith.addf %18, %20 : vector<64x128xf32>
    %cst_17 = arith.constant 0.000000e+00 : f32
    %22 = vector.broadcast %cst_17 : f32 to vector<64x128xf32>
    %23 = arith.maximumf %21, %22 : vector<64x128xf32>
    %c0_18 = arith.constant 0 : index
    %c0_19 = arith.constant 0 : index
    %24 = vector.load %arg8[%c0_18, %c0_19] : memref<64x1xf32, #tpu.memory_space<vmem>>, vector<64x1xf32>
    %25 = vector.broadcast %24 : vector<64x1xf32> to vector<64x128xf32>
    %26 = arith.mulf %23, %25 : vector<64x128xf32>
    %cst_20 = arith.constant dense<0.000000e+00> : vector<128xf32>
    %27 = vector.multi_reduction <add>, %26, %cst_20 [0] : vector<64x128xf32> to vector<128xf32>
    %28 = vector.shape_cast %27 : vector<128xf32> to vector<1x128xf32>
    %c0_21 = arith.constant 0 : index
    %c0_22 = arith.constant 0 : index
    %29 = memref.load %arg9[%c0_21, %c0_22] : memref<1x1xf32, #tpu.memory_space<smem>>
    %30 = vector.broadcast %29 : f32 to vector<1x128xf32>
    %31 = arith.addf %28, %30 : vector<1x128xf32>
    %c0_23 = arith.constant 0 : index
    %c0_24 = arith.constant 0 : index
    %32 = vector.load %arg10[%c0_23, %c0_24] : memref<1x128xf32, #tpu.memory_space<vmem>>, vector<1x128xf32>
    tpu.vector_store %arg10[%c0_23, %c0_24], %31 {strides = array<i32>} : memref<1x128xf32, #tpu.memory_space<vmem>>, vector<1x128xf32>,
    return
  }
  func.func @transform_0(%arg0: i32) -> (i32, i32) {
    %c0_i32 = arith.constant 0 : i32
    %c0_i32_0 = arith.constant 0 : i32
    return %c0_i32, %arg0 : i32, i32
  }
  func.func @transform_1(%arg0: i32) -> (i32, i32) {
    %c0_i32 = arith.constant 0 : i32
    %c0_i32_0 = arith.constant 0 : i32
    %c0_i32_1 = arith.constant 0 : i32
    return %c0_i32, %c0_i32_0 : i32, i32
  }
  func.func @transform_2(%arg0: i32) -> (i32, i32) {
    %c0_i32 = arith.constant 0 : i32
    %c0_i32_0 = arith.constant 0 : i32
    %c0_i32_1 = arith.constant 0 : i32
    return %c0_i32, %c0_i32_0 : i32, i32
  }
  func.func @transform_3(%arg0: i32) -> (i32, i32) {
    %c0_i32 = arith.constant 0 : i32
    %c0_i32_0 = arith.constant 0 : i32
    %c0_i32_1 = arith.constant 0 : i32
    return %c0_i32, %c0_i32_0 : i32, i32
  }
  func.func @transform_4(%arg0: i32) -> (i32, i32) {
    %c0_i32 = arith.constant 0 : i32
    %c0_i32_0 = arith.constant 0 : i32
    %c0_i32_1 = arith.constant 0 : i32
    return %c0_i32, %c0_i32_0 : i32, i32
  }
  func.func @transform_5(%arg0: i32) -> (i32, i32) {
    %c0_i32 = arith.constant 0 : i32
    %c0_i32_0 = arith.constant 0 : i32
    %c0_i32_1 = arith.constant 0 : i32
    return %c0_i32, %c0_i32_0 : i32, i32
  }
  func.func @transform_6(%arg0: i32) -> (i32, i32) {
    %c0_i32 = arith.constant 0 : i32
    %c0_i32_0 = arith.constant 0 : i32
    %c0_i32_1 = arith.constant 0 : i32
    return %c0_i32, %c0_i32_0 : i32, i32
  }
  func.func @transform_7(%arg0: i32) -> (i32, i32) {
    %c0_i32 = arith.constant 0 : i32
    %c0_i32_0 = arith.constant 0 : i32
    %c0_i32_1 = arith.constant 0 : i32
    return %c0_i32, %c0_i32_0 : i32, i32
  }
  func.func @transform_8(%arg0: i32) -> (i32, i32) {
    %c0_i32 = arith.constant 0 : i32
    %c0_i32_0 = arith.constant 0 : i32
    %c0_i32_1 = arith.constant 0 : i32
    return %c0_i32, %c0_i32_0 : i32, i32
  }
  func.func @transform_9(%arg0: i32) -> (i32, i32) {
    %c0_i32 = arith.constant 0 : i32
    %c0_i32_0 = arith.constant 0 : i32
    return %c0_i32, %arg0 : i32, i32
  }
}

</mosaic_0001>

<bundles_post_ra>
// kernel: tpu_custom_call.1
= control target key start
LH: loop header
LB: loop body
LE: loop exit
PB: predicated region body
PF: predicated region fallthrough
CT: control target
= control target key end

     0   :  { %vm130_vm0 = vcmask 1043456   ;;  %vm131_vm1 = vcmask 1044480   ;;  %v642_v1 = vmov 65535   ;;  %vm117_vm2 = vcmask 203776   ;;  %s819_s0 = inlined_call_operand.vmem [shape: bf16[25,128], index: 0, kind: input, shape index: {}]   ;;  %s820_s1 = inlined_call_operand.vmem [shape: bf16[54,25], index: 1, kind: input, shape index: {}]   ;;  %s821_s2 = inlined_call_operand.vmem [shape: f32[54,1], index: 2, kind: input, shape index: {}]   ;;  %s822_s3 = inlined_call_operand.vmem [shape: bf16[16,54], index: 3, kind: input, shape index: {}]   ;;  %s823_s4 = inlined_call_operand.vmem [shape: f32[16,1], index: 4, kind: input, shape index: {}]   ;;  %s824_s5 = inlined_call_operand.vmem [shape: bf16[64,16], index: 5, kind: input, shape index: {}]   ;;  %s825_s6 = inlined_call_operand.vmem [shape: f32[64,1], index: 6, kind: input, shape index: {}]   ;;  %s826_s7 = inlined_call_operand.vmem [shape: f32[64,1], index: 7, kind: input, shape index: {}]   ;;  %s827_s8 = inlined_call_operand.<no memory space> [shape: f32[1,1], index: 8, kind: input, shape index: {}]   ;;  %s828_s9 = inlined_call_operand.hbm [shape: f32[1,128], index: 9, kind: output, shape index: {}]  }
   0x1   :  { %v609_v0 = vld [vmem:[%s819_s0 + $0x8] sm:$0x1f]   ;;  %v132_v2 = vsel %vm130_vm0, 4294967295, %v642_v1  ;;  %v611_v3 = vld [vmem:[%s820_s1] sm:$0xff]   ;;  %v643_v7 = vmov 0   ;;  %v48_v11 = vld [vmem:[%s821_s2 + $0x10] sm:$0xff] }
   0x2   :  { %v133_v4 = vsel %vm131_vm1, %v132_v2, 0  ;;  %v610_v6 = vld [vmem:[%s819_s0] sm:$0xff]   ;;  %572 = vmatprep.mubr.msk.bf16.mxu1 %vm117_vm2, %v611_v3  ;;  %607 = vset.pattern.permute.xlu0 %v643_v7  ;;  %v52_v8 = vld [vmem:[%s821_s2 + $0x30] sm:$0x3f]  ;;  %v51_v9 = vld [vmem:[%s821_s2 + $0x28] sm:$0xff] }
   0x3   :  { %v135_v5 = vand.u32 %v609_v0, %v133_v4  ;;  %608 = vset.pattern.permute.xlu1 %v643_v7  ;;  %85 = vperm.xlu0 %607, %v52_v8   ;;  %v50_v10 = vld [vmem:[%s821_s2 + $0x20] sm:$0xff]  ;;  %v612_v12 = vld [vmem:[%s820_s1 + $0x8] sm:$0xff]   ;;  %v613_v13 = vld [vmem:[%s820_s1 + $0x10] sm:$0xff]  }
   0x4   :  { %80 = vperm.xlu1 %608, %v51_v9   ;;  %v49_v14 = vld [vmem:[%s821_s2 + $0x18] sm:$0xff]  ;;  %v46_v15 = vld [vmem:[%s821_s2] sm:$0xff]  ;;  %v47_v16 = vld [vmem:[%s821_s2 + $0x8] sm:$0xff] }
   0x5   :  { %568 = vmatprep.subr.bf16.mxu1 %v135_v5  ;;  %v214_v17 = vld [vmem:[%s823_s4] sm:$0xff]  ;;  %v614_v18 = vld [vmem:[%s820_s1 + $0x18] ss:$0 sps:$4 sm:$0x77]  }
   0x6   :  { %569 = vmatpush3.bf16.msra.mxu1 %v135_v5 }
   0x7   :  { %570 = vmatprep.subr.bf16.mxu1 %v610_v6  ;;  %75 = vperm.xlu0 %607, %v50_v10  }
   0x8   :  { %65 = vperm.xlu1 %608, %v48_v11  }
   0xa   :  { %571 = vmatpush3.bf16.msra.mxu1 %v610_v6 }
   0xb   :  { %70 = vperm.xlu0 %607, %v49_v14  }
   0xc   :  { %55 = vperm.xlu1 %608, %v46_v15  }
   0xd   :  { %573 = vmatmul.mubr.msk.bf16.vlgmr.msra.gmra.mxu1 %vm117_vm2, %v612_v12 }
   0xe   :  { %576 = vmatprep.mubr.msk.bf16.mxu1 %vm117_vm2, %v613_v13 }
   0xf   :  { %15 = vsyncpa [#allocation4], 0  ;;  %60 = vperm.xlu0 %607, %v47_v16   ;;  %v215_v19 = vld [vmem:[%s823_s4 + $0x8] sm:$0xff]  ;;  %v291_v20 = vld [vmem:[%s825_s6] sm:$0xff]  ;;  %v644_v36 = vmov 0.0   ;;  %vm645_vm3 = vmmov 0  }
  0x10   :  { %218 = vperm.xlu1 %608, %v214_v17   ;;  %v292_v21 = vld [vmem:[%s825_s6 + $0x8] sm:$0xff]  ;;  %v293_v22 = vld [vmem:[%s825_s6 + $0x10] sm:$0xff]  ;;  %v294_v23 = vld [vmem:[%s825_s6 + $0x18] sm:$0xff]  ;;  %580 = vmatprep.subr.bf16.mxu1 %v644_v36  ;;  %vm235_vm4 = vcmask 1042432   ;;  %vm231_vm5 = vcmask 441344   ;;  %vm359_vm6 = vcmask 130048  }
  0x11   :  { %v445_v24 = vld [vmem:[%s826_s7] sm:$0xff]  ;;  %v446_v25 = vld [vmem:[%s826_s7 + $0x8] sm:$0xff]  ;;  %v447_v27 = vld [vmem:[%s826_s7 + $0x10] sm:$0xff]  ;;  %s646_s28 = smov [#allocation3]  }
  0x12   :  { %v295_v26 = vld [vmem:[%s825_s6 + $0x20] sm:$0xff]  ;;  %v296_v28 = vld [vmem:[%s825_s6 + $0x28] sm:$0xff]  ;;  %v448_v29 = vld [vmem:[%s826_s7 + $0x18] sm:$0xff]  ;;  %s524_s29 = sshll.u32 %s646_s28, 4  ;;  %s525_s29 = int_to_ptr.vmem [resolvable:$true] %s524_s29 }
  0x13   :  { %223 = vperm.xlu0 %607, %v215_v19   ;;  %v297_v30 = vld [vmem:[%s825_s6 + $0x30] sm:$0xff]  ;;  %v449_v31 = vld [vmem:[%s826_s7 + $0x20] sm:$0xff]  ;;  %v298_v32 = vld [vmem:[%s825_s6 + $0x38] sm:$0xff]  ;;  %s620_s30 = scalar_lea.vmem %s525_s29, 16  ;;  %s624_s10 = scalar_lea.vmem %s525_s29, 32 }
  0x14   :  { %301 = vperm.xlu1 %608, %v291_v20   ;;  %v450_v33 = vld [vmem:[%s826_s7 + $0x28] sm:$0xff]  ;;  %v451_v34 = vld [vmem:[%s826_s7 + $0x30] sm:$0xff]  ;;  %v452_v35 = vld [vmem:[%s826_s7 + $0x38] sm:$0xff]  ;;  %p621_p0 = scmp.ne.s32.totalorder %s525_s29, %s620_s30  ;;  %p625_p1 = scmp.lt.s32.totalorder %s525_s29, %s525_s29 }
  0x15   :  { %577 = vmatmul.mubr.msk.bf16.gmra.mxu1 %vm117_vm2, %v614_v18  ;;  %v615_v7 = vld [vmem:[%s822_s3] sm:$0xff]   ;;  %v617_v20 = vld [vmem:[%s824_s5 + $0x8] sm:$0xff]   ;;  %p626_p2 = scmp.lt.s32.totalorder %s624_s10, %s620_s30 }
  0x16   :  { %588 = vmatprep.mubr.msk.bf16.mxu1 %vm645_vm3, %v644_v36  ;;  %v616_v8 = vld [vmem:[%s824_s5] sm:$0xff]  }
  0x17   :  { %306 = vperm.xlu0 %607, %v292_v21   ;;  %594 = vmatprep.mubr.msk.bf16.mxu0 %vm359_vm6, %v616_v8  ;;  %v618_v21 = vld [vmem:[%s824_s5 + $0x10] sm:$0xff]   ;;  %p627_p3 = por %p626_p2, %p625_p1 }
  0x18   :  { %311 = vperm.xlu1 %608, %v293_v22   ;;  %v619_v22 = vld [vmem:[%s824_s5 + $0x18] sm:$0xff]  }
  0x19   :  { %p628_p4 = pnand %p627_p3, %p621_p0 }
  0x1b   :  { %316 = vperm.xlu0 %607, %v294_v23  }
  0x1c   :  { %455 = vperm.xlu1 %608, %v445_v24  }
  0x1f   :  { %460 = vperm.xlu0 %607, %v446_v25  }
  0x20   :  { %321 = vperm.xlu1 %608, %v295_v26  }
  0x23   :  { %465 = vperm.xlu0 %607, %v447_v27  }
  0x24   :  { %326 = vperm.xlu1 %608, %v296_v28  }
  0x27   :  { %470 = vperm.xlu0 %607, %v448_v29  }
  0x28   :  { %331 = vperm.xlu1 %608, %v297_v30  }
  0x2b   :  { %475 = vperm.xlu0 %607, %v449_v31  }
  0x2c   :  { %336 = vperm.xlu1 %608, %v298_v32  }
  0x2f   :  { %480 = vperm.xlu0 %607, %v450_v33  }
  0x30   :  { %485 = vperm.xlu1 %608, %v451_v34  }
  0x33   :  { %490 = vperm.xlu0 %607, %v452_v35  }
  0x7e   :  { %v86_v37 = vpop.permute.xlu0 %85 }
  0x7f   :  { %v81_v43 = vpop.permute.xlu1 %80 }
  0x82   :  { %v76_v41 = vpop.permute.xlu0 %75 }
  0x83   :  { %v66_v52 = vpop.permute.xlu1 %65 }
  0x86   :  { %v71_v48 = vpop.permute.xlu0 %70 }
  0x87   :  { %v56_v0 = vpop.permute.xlu1 %55 }
  0x8a   :  { %v61_v60 = vpop.permute.xlu0 %60 }
  0x8b   :  { %v219_v10 = vpop.permute.xlu1 %218 }
  0x8e   :  { %v224_v13 = vpop.permute.xlu0 %223 }
  0x8f   :  { %v302_v23 = vpop.permute.xlu1 %301 }
  0x92   :  { %v307_v24 = vpop.permute.xlu0 %306 }
  0x93   :  { %v312_v25 = vpop.permute.xlu1 %311 }
  0x96   :  { %v317_v26 = vpop.permute.xlu0 %316 }
  0x97   :  { %v456_v27 = vpop.permute.xlu1 %455 }
  0x9a   :  { %v461_v28 = vpop.permute.xlu0 %460 }
  0x9b   :  { %v322_v29 = vpop.permute.xlu1 %321 }
  0x9e   :  { %v466_v30 = vpop.permute.xlu0 %465 }
  0x9f   :  { %v327_v32 = vpop.permute.xlu1 %326 }
  0xa2   :  { %v471_v35 = vpop.permute.xlu0 %470 }
  0xcd   :  { %v574_v38 = vpop.f32.mrf.mxu1 }
  0xce   :  { %v180_v57 = vadd.f32 %v574_v38, %v66_v52 }
  0xcf   :  { %v171_v39 = vpop.f32.mrf.mxu1 }
  0xd0   :  { %v203_v1 = vmax.f32 %v180_v57, 0.0  ;;  %v172_v2 = vadd.f32 %v171_v39, %v56_v0 }
  0xd1   :  { %v575_v40 = vpop.f32.mrf.mxu1 }
  0xd2   :  { %v183_v54 = vadd.f32 %v575_v40, %v71_v48  ;;  %v201_v5 = vmax.f32 %v172_v2, 0.0 }
  0xd3   :  { %v174_v42 = vpop.f32.mrf.mxu1 }
  0xd4   :  { %v204_v61 = vmax.f32 %v183_v54, 0.0  ;;  %v175_v62 = vadd.f32 %v174_v42, %v61_v60  ;;  %v332_v42 = vpop.permute.xlu1 %331 }
  0xd5   :  { %v578_v44 = vpop.f32.mrf.mxu1 }
  0xd6   :  { %v196_v45 = vadd.f32 %v578_v44, %v86_v37  ;;  %v211_v3 = vpack.c.bf16 %v204_v61, %v203_v1  ;;  %v202_v4 = vmax.f32 %v175_v62, 0.0 }
  0xd7   :  { %v187_v46 = vpop.f32.mrf.mxu1 }
  0xd8   :  { %v207_v47 = vmax.f32 %v196_v45, 0.0  ;;  %v188_v51 = vadd.f32 %v187_v46, %v76_v41  ;;  %v210_v6 = vpack.c.bf16 %v202_v4, %v201_v5  ;;  %v476_v46 = vpop.permute.xlu0 %475  ;;  %v337_v57 = vpop.permute.xlu1 %336 }
  0xd9   :  { %v579_v49 = vpop.f32.mrf.mxu1 }
  0xda   :  { %v213_v50 = vpack.c.bf16 %v207_v47, %v207_v47  ;;  %v205_v58 = vmax.f32 %v188_v51, 0.0 }
  0xdb   :  { %v190_v53 = vpop.f32.mrf.mxu1 }
  0xdc   :  { %v191_v55 = vadd.f32 %v190_v53, %v81_v43  ;;  %v237_v56 = vsel %vm235_vm4, %v213_v50, 0 }
  0xdd   :  { %581 = vmatpush3.bf16.msra.mxu1 %v237_v56 }
  0xde   :  { %v206_v59 = vmax.f32 %v191_v55, 0.0  ;;  %582 = vmatprep.subr.bf16.mxu1 %v644_v36 }
  0xe0   :  { %v212_v63 = vpack.c.bf16 %v206_v59, %v205_v58 }
  0xe2   :  { %583 = vmatpush3.bf16.msra.mxu1 %v212_v63  ;;  %v481_v63 = vpop.permute.xlu0 %480 }
  0xe3   :  { %584 = vmatprep.subr.bf16.mxu1 %v644_v36 }
  0xe6   :  { %585 = vmatpush3.bf16.msra.mxu1 %v211_v3 }
  0xe7   :  { %586 = vmatprep.subr.bf16.mxu1 %v644_v36 }
  0xea   :  { %587 = vmatpush3.bf16.msra.mxu1 %v210_v6 }
  0xed   :  { %589 = vmatmul.mubr.msk.bf16.vlgmr.msra.gmra.mxu1 %vm231_vm5, %v615_v7  ;;  %v486_v7 = vpop.permute.xlu1 %485 }
 0x1ad   :  { %v273_v9 = vpop.f32.mrf.mxu1 }
 0x1ae   :  { %v274_v12 = vadd.f32 %v273_v9, %v219_v10  ;;  %v491_v10 = vpop.permute.xlu0 %490 }
 0x1af   :  { %v590_v11 = vpop.f32.mrf.mxu1 }
 0x1b0   :  { %v280_v17 = vmax.f32 %v274_v12, 0.0 }
 0x1b1   :  { %v276_v14 = vpop.f32.mrf.mxu1 }
 0x1b2   :  { %v277_v15 = vadd.f32 %v276_v14, %v224_v13 }
 0x1b3   :  { %v591_v16 = vpop.f32.mrf.mxu1 }
 0x1b4   :  { %v281_v18 = vmax.f32 %v277_v15, 0.0 }
 0x1b6   :  { %v290_v19 = vpack.c.bf16 %v281_v18, %v280_v17 }
 0x1b8   :  { %592 = vmatprep.subr.bf16.mxu0 %v290_v19 }
 0x1b9   :  { %593 = vmatpush3.bf16.msra.mxu0 %v290_v19  ;;  %v515_v19 = vstv %s827_s8 }
 0x1bc   :  { %595 = vmatmul.mubr.msk.bf16.vlgmr.msra.gmra.mxu0 %vm359_vm6, %v617_v20 }
 0x1bd   :  { %598 = vmatprep.mubr.msk.bf16.mxu0 %vm359_vm6, %v618_v21 }
 0x1c4   :  { %599 = vmatmul.mubr.msk.bf16.gmra.mxu0 %vm359_vm6, %v619_v22 }
 0x27c   :  { %v596_v31 = vpop.f32.mrf.mxu0 }
 0x27d   :  { %v415_v37 = vadd.f32 %v596_v31, %v312_v25 }
 0x27e   :  { %v406_v33 = vpop.f32.mrf.mxu0 }
 0x27f   :  { %v407_v34 = vadd.f32 %v406_v33, %v302_v23  ;;  %v439_v44 = vmax.f32 %v415_v37, 0.0 }
 0x280   :  { %v597_v36 = vpop.f32.mrf.mxu0 }
 0x281   :  { %v437_v39 = vmax.f32 %v407_v34, 0.0  ;;  %v418_v40 = vadd.f32 %v597_v36, %v317_v26  ;;  %v495_v53 = vmul.f32 %v466_v30, %v439_v44 }
 0x282   :  { %v409_v38 = vpop.f32.mrf.mxu0 }
 0x283   :  { %v410_v41 = vadd.f32 %v409_v38, %v307_v24  ;;  %v493_v48 = vmul.f32 %v456_v27, %v437_v39  ;;  %v440_v49 = vmax.f32 %v418_v40, 0.0 }
 0x284   :  { %v600_v43 = vpop.f32.mrf.mxu0 }
 0x285   :  { %v438_v45 = vmax.f32 %v410_v41, 0.0  ;;  %v431_v55 = vadd.f32 %v600_v43, %v332_v42  ;;  %v496_v59 = vmul.f32 %v471_v35, %v440_v49 }
 0x286   :  { %v422_v47 = vpop.f32.mrf.mxu0 }
 0x287   :  { %v494_v50 = vmul.f32 %v461_v28, %v438_v45  ;;  %v423_v51 = vadd.f32 %v422_v47, %v322_v29  ;;  %v443_v0 = vmax.f32 %v431_v55, 0.0 }
 0x288   :  { %v601_v52 = vpop.f32.mrf.mxu0 }
 0x289   :  { %v501_v54 = vadd.f32 %v494_v50, %v493_v48  ;;  %v441_v56 = vmax.f32 %v423_v51, 0.0  ;;  %v434_v61 = vadd.f32 %v601_v52, %v337_v57  ;;  %v499_v8 = vmul.f32 %v486_v7, %v443_v0 }
 0x28a   :  { %v425_v58 = vpop.f32.mrf.mxu0 }
 0x28b   :  { %v502_v60 = vadd.f32 %v501_v54, %v495_v53  ;;  %v426_v62 = vadd.f32 %v425_v58, %v327_v32  ;;  %v497_v1 = vmul.f32 %v476_v46, %v441_v56  ;;  %v444_v5 = vmax.f32 %v434_v61, 0.0 }
 0x28d   :  { %v503_v2 = vadd.f32 %v502_v60, %v496_v59  ;;  %v442_v3 = vmax.f32 %v426_v62, 0.0  ;;  %v500_v11 = vmul.f32 %v491_v10, %v444_v5 }
 0x28f   :  { %v504_v4 = vadd.f32 %v503_v2, %v497_v1  ;;  %v498_v6 = vmul.f32 %v481_v63, %v442_v3 }
 0x291   :  { %v505_v9 = vadd.f32 %v504_v4, %v498_v6 }
 0x293   :  { %v506_v12 = vadd.f32 %v505_v9, %v499_v8 }
 0x295   :  { %v507_v13 = vadd.f32 %v506_v12, %v500_v11 }
 0x297   :  { %v508_v14 = vrot.slane %v507_v13, 4 }
 0x299   :  { %v509_v15 = vadd.f32 %v508_v14, %v507_v13 }
 0x29b   :  { %v510_v16 = vrot.slane %v509_v15, 2 }
 0x29d   :  { %v511_v17 = vadd.f32 %v510_v16, %v509_v15 }
 0x29f   :  { %v512_v18 = vrot.slane %v511_v17, 1 }
 0x2a1   :  { %v513_v20 = vadd.f32 %v512_v18, %v511_v17 }
 0x2a3   :  { %v516_v21 = vadd.f32 %v515_v19, %v513_v20 }
 0x2a5   :  { %517 = vst [vmem:[#allocation3] sm:$0x1] %v516_v21 }
 0x2a6   :  { %631 = shalt.err (!%p628_p4)
}
 0x2a7   :  { %527 = dma.vmem_to_hbm [thread:$0]  %s525_s29, 16, %s828_s9, [#allocation4]  }
 0x2a8   :  { %640 = dma.done.wait [#allocation4], 16  }
 0x2a9   :  { %641 = vsyncadd [#allocation4], 4294967280 }
 0x2aa   :  { %531 = vsyncpa [#allocation4], 1 }

</bundles_post_ra>
